<compile_context>
chip_gen: v6e
topology: v6e:2x2x1
jax: 0.10.0
libtpu: 0.0.40
codegen_flags: <defaults>
</compile_context>

<pallas_src>
import jax
import jax.numpy as jnp
from jax.experimental import pallas as pl
from jax.experimental.pallas import tpu as pltpu

_LANE = 128


def _round_up(x, m):
    return -(-x // m) * m


def _mlp_kernel(x_ref,
                w1_ref, b1_ref,
                w2_ref, b2_ref,
                w3_ref, b3_ref,
                w4t_ref, b4_ref,
                o_ref):
    # x_ref: [TB, in_f] natural layout.  The transpose feeds the dot directly
    # (same pattern as q @ k.T in the reference kernels), so Mosaic lowers it
    # as a transposed-operand matmul; batch lands on the lane axis.
    xt = x_ref[...].T                                                    # [in_f, TB]

    # fc1 + ReLU      (dropout1: identity in eval mode)
    h = jnp.dot(w1_ref[...], xt, preferred_element_type=jnp.float32) + b1_ref[...]
    h = jnp.maximum(h, 0.0)                                              # [128, TB]

    # fc2 + Tanh      (dropout2: identity in eval mode)
    h = jnp.dot(w2_ref[...], h, preferred_element_type=jnp.float32) + b2_ref[...]
    h = jnp.tanh(h)                                                      # [64, TB]

    # fc3 + Sigmoid   (dropout3: identity in eval mode)
    # sigmoid(x) = 0.5*(tanh(x/2)+1): one EUP op instead of exp + divide.
    h = jnp.dot(w3_ref[...], h, preferred_element_type=jnp.float32) + b3_ref[...]
    h = 0.5 * (jnp.tanh(0.5 * h) + 1.0)                                  # [32, TB]

    # fc4 + Tanh: M=1, K=32 — VPU multiply + sublane reduce instead of an MXU
    # push/drain at the end of the serial 4-matmul dependence chain.
    h = jnp.sum(w4t_ref[...] * h, axis=0, keepdims=True) + b4_ref[...]   # [1, TB]
    o_ref[...] = jnp.tanh(h).astype(o_ref.dtype)


def _choose_tile_b(batch, in_f):
    # f32 bytes per batch row resident in VMEM each grid step:
    #   x tile (double-buffered): 2*in_f, in-kernel transposed copy: in_f,
    #   activations: 128+64+32+1, output (double-buffered): 2.
    bytes_per_row = 4 * (3 * in_f + 128 + 64 + 32 + 1 + 2)
    budget = 24 * 1024 * 1024            # conservative: fits v7x's 64 MiB VMEM
    tb = min(8192, budget // bytes_per_row)
    tb = max(_LANE, (tb // _LANE) * _LANE)
    # Keep >= 2 grid steps when the batch allows it so the "parallel" axis can
    # actually split across v7x's two TensorCores.
    tb = min(tb, _round_up(max(1, -(-batch // 2)), _LANE))
    return max(_LANE, tb)


def net_forward(x, params, *, tile_b=None):
    """x: [B, input_size] float32.  params: PyTorch-layout weights [out, in]."""
    B, in_f = x.shape
    w1, b1 = params["w1"], params["b1"]
    w2, b2 = params["w2"], params["b2"]
    w3, b3 = params["w3"], params["b3"]
    w4, b4 = params["w4"], params["b4"]

    tb = tile_b if tile_b is not None else _choose_tile_b(B, in_f)
    tb = max(_LANE, _round_up(tb, _LANE))
    grid_b = pl.cdiv(B, tb)              # ragged tail block; no padded copy of x

    # Biases as column vectors [F, 1] so they broadcast across the lane (batch)
    # axis.  fc4 weight pre-transposed to [32, 1] for the in-kernel VPU reduce.
    args = (x,
            w1, b1.reshape(-1, 1),
            w2, b2.reshape(-1, 1),
            w3, b3.reshape(-1, 1),
            w4.reshape(-1, 1), b4.reshape(1, 1))

    def _stream_x(i):      # new batch-row tile every grid step
        return (i, 0)

    def _stream_out(i):    # lane-dense output tile every grid step
        return (0, i)

    def _resident(i):      # weights & biases: constant block -> stay in VMEM
        return (0, 0)

    in_specs = [
        pl.BlockSpec((tb, in_f), _stream_x),
        pl.BlockSpec(w1.shape, _resident), pl.BlockSpec((w1.shape[0], 1), _resident),
        pl.BlockSpec(w2.shape, _resident), pl.BlockSpec((w2.shape[0], 1), _resident),
        pl.BlockSpec(w3.shape, _resident), pl.BlockSpec((w3.shape[0], 1), _resident),
        pl.BlockSpec((w4.shape[1], 1), _resident), pl.BlockSpec((1, 1), _resident),
    ]
    out_specs = pl.BlockSpec((1, tb), _stream_out)
    out_shape = jax.ShapeDtypeStruct((1, B), x.dtype)

    # Explicit scoped-VMEM limit derived from the actual buffers (v5e default
    # is only 16 MiB); clamped well under v7x's 64 MiB physical VMEM.
    weight_bytes = 4 * sum(int(p.size) for p in params.values())
    est_vmem = 4 * tb * (3 * in_f + 128 + 64 + 32 + 1 + 2) + 2 * weight_bytes
    vmem_limit = int(min(48 << 20, max(32 << 20, 2 * est_vmem)))

    # Advisory cost estimate so XLA can schedule around this small call.
    n_rows = grid_b * tb
    flops = 2 * n_rows * (in_f * 128 + 128 * 64 + 64 * 32 + 32 * 1)
    transcendentals = n_rows * (64 + 32 + 1)
    bytes_accessed = (B * in_f + B) * 4 + weight_bytes
    cost = pl.CostEstimate(flops=int(flops),
                           transcendentals=int(transcendentals),
                           bytes_accessed=int(bytes_accessed))

    out = pl.pallas_call(
        _mlp_kernel,
        out_shape=out_shape,
        grid=(grid_b,),
        in_specs=in_specs,
        out_specs=out_specs,
        compiler_params=pltpu.CompilerParams(
            dimension_semantics=("parallel",),   # 2-TC batch sharding on v7x
            vmem_limit_bytes=vmem_limit,
        ),
        cost_estimate=cost,
    )(*args)

    # [1, B] lane-dense slab -> [B, 1]; trivial reshape (a size-1 dim moves).
    return out.reshape(B, 1)


def init_params(key, input_size):
    """Deterministic init mimicking PyTorch nn.Linear: W [out, in], b [out],
    U(-1/sqrt(fan_in), +1/sqrt(fan_in))."""
    dims = [(input_size, 128), (128, 64), (64, 32), (32, 1)]
    params = {}
    for i, (fan_in, fan_out) in enumerate(dims, start=1):
        key, kw, kb = jax.random.split(key, 3)
        bound = 1.0 / (fan_in ** 0.5)
        params[f"w{i}"] = jax.random.uniform(
            kw, (fan_out, fan_in), jnp.float32, -bound, bound)
        params[f"b{i}"] = jax.random.uniform(
            kb, (fan_out,), jnp.float32, -bound, bound)
    return params


def net_forward_ref(x, params):
    """Pure-JAX reference for correctness check (PyTorch semantics)."""
    h = jnp.maximum(x @ params["w1"].T + params["b1"], 0.0)
    h = jnp.tanh(h @ params["w2"].T + params["b2"])
    h = jax.nn.sigmoid(h @ params["w3"].T + params["b3"])
    return jnp.tanh(h @ params["w4"].T + params["b4"])


if __name__ == "__main__":
    key = jax.random.PRNGKey(0)
    input_size = 32
    batch = 8

    key, kx, kp = jax.random.split(key, 3)
    x = jax.random.normal(kx, (batch, input_size), jnp.float32)
    params = init_params(kp, input_size)

    out = jax.block_until_ready(net_forward(x, params))

    ref = net_forward_ref(x, params)
    assert out.shape == (batch, 1)
    assert jnp.allclose(out, ref, atol=1e-5, rtol=1e-5), (
        f"max abs err = {float(jnp.max(jnp.abs(out - ref)))}")

    print("KERNEL_OK")
</pallas_src>

<mosaic_0001>
module attributes {stable_mosaic.version = 11 : i64} {
  func.func @_mlp_kernel(%arg0: i32, %arg1: memref<128x32xf32, #tpu.memory_space<vmem>>, %arg2: memref<128x32xf32, #tpu.memory_space<vmem>>, %arg3: memref<128x1xf32, #tpu.memory_space<vmem>>, %arg4: memref<64x128xf32, #tpu.memory_space<vmem>>, %arg5: memref<64x1xf32, #tpu.memory_space<vmem>>, %arg6: memref<32x64xf32, #tpu.memory_space<vmem>>, %arg7: memref<32x1xf32, #tpu.memory_space<vmem>>, %arg8: memref<32x1xf32, #tpu.memory_space<vmem>>, %arg9: memref<1x1xf32, #tpu.memory_space<vmem>>, %arg10: memref<1x128xf32, #tpu.memory_space<vmem>>) attributes {dimension_semantics = [#tpu.dimension_semantics<parallel>], iteration_bounds = array<i64: 1>, scalar_prefetch = 0 : i64, scratch_operands = 0 : i64, tpu.core_type = #tpu.core_type<tc>, window_params = [{transform_indices = @transform_0, window_bounds = array<i64: 128, 32>}, {pipeline_mode = #tpu.pipeline_mode<synchronous>, transform_indices = @transform_1, window_bounds = array<i64: 128, 32>}, {pipeline_mode = #tpu.pipeline_mode<synchronous>, transform_indices = @transform_2, window_bounds = array<i64: 128, 1>}, {pipeline_mode = #tpu.pipeline_mode<synchronous>, transform_indices = @transform_3, window_bounds = array<i64: 64, 128>}, {pipeline_mode = #tpu.pipeline_mode<synchronous>, transform_indices = @transform_4, window_bounds = array<i64: 64, 1>}, {pipeline_mode = #tpu.pipeline_mode<synchronous>, transform_indices = @transform_5, window_bounds = array<i64: 32, 64>}, {pipeline_mode = #tpu.pipeline_mode<synchronous>, transform_indices = @transform_6, window_bounds = array<i64: 32, 1>}, {pipeline_mode = #tpu.pipeline_mode<synchronous>, transform_indices = @transform_7, window_bounds = array<i64: 32, 1>}, {pipeline_mode = #tpu.pipeline_mode<synchronous>, transform_indices = @transform_8, window_bounds = array<i64: 1, 1>}, {transform_indices = @transform_9, window_bounds = array<i64: 1, 128>}]} {
    %c0 = arith.constant 0 : index
    %c0_0 = arith.constant 0 : index
    %0 = vector.load %arg1[%c0, %c0_0] : memref<128x32xf32, #tpu.memory_space<vmem>>, vector<128x32xf32>
    %1 = tpu.transpose %0, [1, 0] : vector<128x32xf32> -> vector<32x128xf32>
    %c0_1 = arith.constant 0 : index
    %c0_2 = arith.constant 0 : index
    %2 = vector.load %arg2[%c0_1, %c0_2] : memref<128x32xf32, #tpu.memory_space<vmem>>, vector<128x32xf32>
    %cst = arith.constant dense<0.000000e+00> : vector<128x128xf32>
    %3 = tpu.matmul %2, %1, %cst {dimension_numbers = #tpu.dot_dimension_numbers<[1], [0], [0], [1], [0, 0, 1, 1], [], []>} : vector<128x32xf32>, vector<32x128xf32>, vector<128x128xf32> -> vector<128x128xf32>
    %c0_3 = arith.constant 0 : index
    %c0_4 = arith.constant 0 : index
    %4 = vector.load %arg3[%c0_3, %c0_4] : memref<128x1xf32, #tpu.memory_space<vmem>>, vector<128x1xf32>
    %5 = vector.broadcast %4 : vector<128x1xf32> to vector<128x128xf32>
    %6 = arith.addf %3, %5 : vector<128x128xf32>
    %cst_5 = arith.constant 0.000000e+00 : f32
    %7 = vector.broadcast %cst_5 : f32 to vector<128x128xf32>
    %8 = arith.maximumf %6, %7 : vector<128x128xf32>
    %c0_6 = arith.constant 0 : index
    %c0_7 = arith.constant 0 : index
    %9 = vector.load %arg4[%c0_6, %c0_7] : memref<64x128xf32, #tpu.memory_space<vmem>>, vector<64x128xf32>
    %cst_8 = arith.constant dense<0.000000e+00> : vector<64x128xf32>
    %10 = tpu.matmul %9, %8, %cst_8 {dimension_numbers = #tpu.dot_dimension_numbers<[1], [0], [0], [1], [0, 0, 1, 1], [], []>} : vector<64x128xf32>, vector<128x128xf32>, vector<64x128xf32> -> vector<64x128xf32>
    %c0_9 = arith.constant 0 : index
    %c0_10 = arith.constant 0 : index
    %11 = vector.load %arg5[%c0_9, %c0_10] : memref<64x1xf32, #tpu.memory_space<vmem>>, vector<64x1xf32>
    %12 = vector.broadcast %11 : vector<64x1xf32> to vector<64x128xf32>
    %13 = arith.addf %10, %12 : vector<64x128xf32>
    %14 = math.tanh %13 : vector<64x128xf32>
    %c0_11 = arith.constant 0 : index
    %c0_12 = arith.constant 0 : index
    %15 = vector.load %arg6[%c0_11, %c0_12] : memref<32x64xf32, #tpu.memory_space<vmem>>, vector<32x64xf32>
    %cst_13 = arith.constant dense<0.000000e+00> : vector<32x128xf32>
    %16 = tpu.matmul %15, %14, %cst_13 {dimension_numbers = #tpu.dot_dimension_numbers<[1], [0], [0], [1], [0, 0, 1, 1], [], []>} : vector<32x64xf32>, vector<64x128xf32>, vector<32x128xf32> -> vector<32x128xf32>
    %c0_14 = arith.constant 0 : index
    %c0_15 = arith.constant 0 : index
    %17 = vector.load %arg7[%c0_14, %c0_15] : memref<32x1xf32, #tpu.memory_space<vmem>>, vector<32x1xf32>
    %18 = vector.broadcast %17 : vector<32x1xf32> to vector<32x128xf32>
    %19 = arith.addf %16, %18 : vector<32x128xf32>
    %cst_16 = arith.constant 5.000000e-01 : f32
    %20 = vector.broadcast %cst_16 : f32 to vector<32x128xf32>
    %21 = arith.mulf %20, %19 : vector<32x128xf32>
    %22 = math.tanh %21 : vector<32x128xf32>
    %cst_17 = arith.constant 1.000000e+00 : f32
    %23 = vector.broadcast %cst_17 : f32 to vector<32x128xf32>
    %24 = arith.addf %22, %23 : vector<32x128xf32>
    %cst_18 = arith.constant 5.000000e-01 : f32
    %25 = vector.broadcast %cst_18 : f32 to vector<32x128xf32>
    %26 = arith.mulf %25, %24 : vector<32x128xf32>
    %c0_19 = arith.constant 0 : index
    %c0_20 = arith.constant 0 : index
    %27 = vector.load %arg8[%c0_19, %c0_20] : memref<32x1xf32, #tpu.memory_space<vmem>>, vector<32x1xf32>
    %28 = vector.broadcast %27 : vector<32x1xf32> to vector<32x128xf32>
    %29 = arith.mulf %28, %26 : vector<32x128xf32>
    %cst_21 = arith.constant dense<0.000000e+00> : vector<128xf32>
    %30 = vector.multi_reduction <add>, %29, %cst_21 [0] : vector<32x128xf32> to vector<128xf32>
    %31 = vector.shape_cast %30 : vector<128xf32> to vector<1x128xf32>
    %c0_22 = arith.constant 0 : index
    %c0_23 = arith.constant 0 : index
    %32 = vector.load %arg9[%c0_22, %c0_23] : memref<1x1xf32, #tpu.memory_space<vmem>>, vector<1x1xf32>
    %33 = vector.broadcast %32 : vector<1x1xf32> to vector<1x128xf32>
    %34 = arith.addf %31, %33 : vector<1x128xf32>
    %35 = math.tanh %34 : vector<1x128xf32>
    %c0_24 = arith.constant 0 : index
    %c0_25 = arith.constant 0 : index
    %36 = vector.load %arg10[%c0_24, %c0_25] : memref<1x128xf32, #tpu.memory_space<vmem>>, vector<1x128xf32>
    tpu.vector_store %arg10[%c0_24, %c0_25], %35 {strides = array<i32>} : memref<1x128xf32, #tpu.memory_space<vmem>>, vector<1x128xf32>,
    return
  }
  func.func @transform_0(%arg0: i32) -> (i32, i32) {
    %c0_i32 = arith.constant 0 : i32
    %c0_i32_0 = arith.constant 0 : i32
    return %arg0, %c0_i32 : i32, i32
  }
  func.func @transform_1(%arg0: i32) -> (i32, i32) {
    %c0_i32 = arith.constant 0 : i32
    %c0_i32_0 = arith.constant 0 : i32
    %c0_i32_1 = arith.constant 0 : i32
    return %c0_i32, %c0_i32_0 : i32, i32
  }
  func.func @transform_2(%arg0: i32) -> (i32, i32) {
    %c0_i32 = arith.constant 0 : i32
    %c0_i32_0 = arith.constant 0 : i32
    %c0_i32_1 = arith.constant 0 : i32
    return %c0_i32, %c0_i32_0 : i32, i32
  }
  func.func @transform_3(%arg0: i32) -> (i32, i32) {
    %c0_i32 = arith.constant 0 : i32
    %c0_i32_0 = arith.constant 0 : i32
    %c0_i32_1 = arith.constant 0 : i32
    return %c0_i32, %c0_i32_0 : i32, i32
  }
  func.func @transform_4(%arg0: i32) -> (i32, i32) {
    %c0_i32 = arith.constant 0 : i32
    %c0_i32_0 = arith.constant 0 : i32
    %c0_i32_1 = arith.constant 0 : i32
    return %c0_i32, %c0_i32_0 : i32, i32
  }
  func.func @transform_5(%arg0: i32) -> (i32, i32) {
    %c0_i32 = arith.constant 0 : i32
    %c0_i32_0 = arith.constant 0 : i32
    %c0_i32_1 = arith.constant 0 : i32
    return %c0_i32, %c0_i32_0 : i32, i32
  }
  func.func @transform_6(%arg0: i32) -> (i32, i32) {
    %c0_i32 = arith.constant 0 : i32
    %c0_i32_0 = arith.constant 0 : i32
    %c0_i32_1 = arith.constant 0 : i32
    return %c0_i32, %c0_i32_0 : i32, i32
  }
  func.func @transform_7(%arg0: i32) -> (i32, i32) {
    %c0_i32 = arith.constant 0 : i32
    %c0_i32_0 = arith.constant 0 : i32
    %c0_i32_1 = arith.constant 0 : i32
    return %c0_i32, %c0_i32_0 : i32, i32
  }
  func.func @transform_8(%arg0: i32) -> (i32, i32) {
    %c0_i32 = arith.constant 0 : i32
    %c0_i32_0 = arith.constant 0 : i32
    %c0_i32_1 = arith.constant 0 : i32
    return %c0_i32, %c0_i32_0 : i32, i32
  }
  func.func @transform_9(%arg0: i32) -> (i32, i32) {
    %c0_i32 = arith.constant 0 : i32
    %c0_i32_0 = arith.constant 0 : i32
    return %c0_i32, %arg0 : i32, i32
  }
}

</mosaic_0001>

<bundles_post_ra>
// kernel: tpu_custom_call.1
= control target key start
LH: loop header
LB: loop body
LE: loop exit
PB: predicated region body
PF: predicated region fallthrough
CT: control target
= control target key end

     0   :  { %s1424_s0 = inlined_call_operand.vmem [shape: f32[8,32], index: 0, kind: input, shape index: {}]   ;;  %s1425_s1 = inlined_call_operand.vmem [shape: f32[128,32], index: 1, kind: input, shape index: {}]   ;;  %s1426_s2 = inlined_call_operand.vmem [shape: f32[128,1], index: 2, kind: input, shape index: {}]   ;;  %s1427_s3 = inlined_call_operand.vmem [shape: f32[64,128], index: 3, kind: input, shape index: {}]   ;;  %s1428_s4 = inlined_call_operand.vmem [shape: f32[64,1], index: 4, kind: input, shape index: {}]   ;;  %s1429_s5 = inlined_call_operand.vmem [shape: f32[32,64], index: 5, kind: input, shape index: {}]   ;;  %s1430_s6 = inlined_call_operand.vmem [shape: f32[32,1], index: 6, kind: input, shape index: {}]   ;;  %s1431_s7 = inlined_call_operand.vmem [shape: f32[32,1], index: 7, kind: input, shape index: {}]   ;;  %s1432_s8 = inlined_call_operand.<no memory space> [shape: f32[1,1], index: 8, kind: input, shape index: {}]   ;;  %s1433_s9 = inlined_call_operand.hbm [shape: f32[1,8], index: 9, kind: output, shape index: {}]  }
   0x1   :  { %v14_v0 = vstv %s1432_s8 }
   0x2   :  { %15 = vst [vmem:[#allocation2] sm:$0x1] %v14_v0 }
   0x3   :  { %v50_v1 = vld [vmem:[%s1424_s0 + $0x78] sm:$0xff]  ;;  %vm163_vm0 = vcmask 261120   ;;  %v49_v2 = vld [vmem:[%s1424_s0 + $0x70] sm:$0xff]  ;;  %v1074_v3 = vmov 0   ;;  %v48_v4 = vld [vmem:[%s1424_s0 + $0x68] sm:$0xff] }
   0x4   :  { %900 = vmatprep.subr.msk.mxu0 %vm163_vm0, %v50_v1  ;;  %1024 = vset.pattern.permute.xlu0 %v1074_v3  ;;  %v51_v5 = vld [vmem:[%s1425_s1] sm:$0xff]  ;;  %v82_v7 = vld [vmem:[%s1426_s2 + $0x78] sm:$0xff]  ;;  %v80_v8 = vld [vmem:[%s1426_s2 + $0x68] sm:$0xff] }
   0x5   :  { %901 = vmatpush3.xpose.msk.msra.mxu0 %vm163_vm0, %v50_v1  ;;  %1025 = vset.pattern.permute.xlu1 %v1074_v3  ;;  %v47_v6 = vld [vmem:[%s1424_s0 + $0x60] sm:$0xff]  ;;  %v46_v9 = vld [vmem:[%s1424_s0 + $0x58] sm:$0xff]  ;;  %v81_v10 = vld [vmem:[%s1426_s2 + $0x70] sm:$0xff] }
   0x6   :  { %902 = vmatprep.subr.msk.mxu0 %vm163_vm0, %v49_v2  ;;  %932 = vmatprep.mubr.msk.f32.mxu0 %vm163_vm0, %v51_v5  ;;  %v79_v11 = vld [vmem:[%s1426_s2 + $0x60] sm:$0xff]  ;;  %v45_v12 = vld [vmem:[%s1424_s0 + $0x50] sm:$0xff]  ;;  %v78_v13 = vld [vmem:[%s1426_s2 + $0x58] sm:$0xff] }
   0x7   :  { %160 = vperm.xlu0 %1024, %v82_v7   ;;  %150 = vperm.xlu1 %1025, %v80_v8   ;;  %v77_v14 = vld [vmem:[%s1426_s2 + $0x50] sm:$0xff]  ;;  %v44_v15 = vld [vmem:[%s1424_s0 + $0x48] sm:$0xff]  ;;  %v75_v17 = vld [vmem:[%s1426_s2 + $0x40] sm:$0xff] }
   0x8   :  { %v76_v16 = vld [vmem:[%s1426_s2 + $0x48] sm:$0xff] }
   0x9   :  { %903 = vmatpush3.xpose.msk.msra.mxu0 %vm163_vm0, %v49_v2 }
   0xa   :  { %904 = vmatprep.subr.msk.mxu0 %vm163_vm0, %v48_v4 }
   0xb   :  { %155 = vperm.xlu0 %1024, %v81_v10   ;;  %145 = vperm.xlu1 %1025, %v79_v11  }
   0xd   :  { %905 = vmatpush3.xpose.msk.msra.mxu0 %vm163_vm0, %v48_v4 }
   0xe   :  { %906 = vmatprep.subr.msk.mxu0 %vm163_vm0, %v47_v6 }
   0xf   :  { %140 = vperm.xlu0 %1024, %v78_v13   ;;  %135 = vperm.xlu1 %1025, %v77_v14  }
  0x11   :  { %907 = vmatpush3.xpose.msk.msra.mxu0 %vm163_vm0, %v47_v6 }
  0x12   :  { %908 = vmatprep.subr.msk.mxu0 %vm163_vm0, %v46_v9 }
  0x15   :  { %909 = vmatpush3.xpose.msk.msra.mxu0 %vm163_vm0, %v46_v9 }
  0x16   :  { %910 = vmatprep.subr.msk.mxu0 %vm163_vm0, %v45_v12 }
  0x17   :  { %16 = vsyncpa [#allocation4], 0  ;;  %130 = vperm.xlu0 %1024, %v76_v16   ;;  %v43_v18 = vld [vmem:[%s1424_s0 + $0x40] sm:$0xff]  ;;  %v74_v19 = vld [vmem:[%s1426_s2 + $0x38] sm:$0xff]  ;;  %125 = vperm.xlu1 %1025, %v75_v17   ;;  %vm618_vm1 = vcmask 523264  }
  0x18   :  { %v73_v20 = vld [vmem:[%s1426_s2 + $0x30] sm:$0xff]  ;;  %v42_v21 = vld [vmem:[%s1424_s0 + $0x38] sm:$0xff]  ;;  %v72_v22 = vld [vmem:[%s1426_s2 + $0x28] sm:$0xff] }
  0x19   :  { %911 = vmatpush3.xpose.msk.msra.mxu0 %vm163_vm0, %v45_v12  ;;  %v71_v23 = vld [vmem:[%s1426_s2 + $0x20] sm:$0xff]  ;;  %v41_v24 = vld [vmem:[%s1424_s0 + $0x30] sm:$0xff]  ;;  %v70_v25 = vld [vmem:[%s1426_s2 + $0x18] sm:$0xff] }
  0x1a   :  { %912 = vmatprep.subr.msk.mxu0 %vm163_vm0, %v44_v15  ;;  %v69_v26 = vld [vmem:[%s1426_s2 + $0x10] sm:$0xff]  ;;  %v40_v27 = vld [vmem:[%s1424_s0 + $0x28] sm:$0xff]  ;;  %v67_v29 = vld [vmem:[%s1426_s2] sm:$0xff] }
  0x1b   :  { %120 = vperm.xlu0 %1024, %v74_v19   ;;  %115 = vperm.xlu1 %1025, %v73_v20   ;;  %v68_v28 = vld [vmem:[%s1426_s2 + $0x8] sm:$0xff]  ;;  %v39_v30 = vld [vmem:[%s1424_s0 + $0x20] sm:$0xff]  ;;  %v436_v31 = vld [vmem:[%s1428_s4 + $0x38] sm:$0xff] }
  0x1c   :  { %v435_v32 = vld [vmem:[%s1428_s4 + $0x30] sm:$0xff]  ;;  %v38_v33 = vld [vmem:[%s1424_s0 + $0x18] sm:$0xff]  ;;  %v434_v34 = vld [vmem:[%s1428_s4 + $0x28] sm:$0xff] }
  0x1d   :  { %913 = vmatpush3.xpose.msk.msra.mxu0 %vm163_vm0, %v44_v15  ;;  %v433_v35 = vld [vmem:[%s1428_s4 + $0x20] sm:$0xff]  ;;  %v37_v36 = vld [vmem:[%s1424_s0 + $0x10] sm:$0xff]  ;;  %v432_v37 = vld [vmem:[%s1428_s4 + $0x18] sm:$0xff] }
  0x1e   :  { %914 = vmatprep.subr.msk.mxu0 %vm163_vm0, %v43_v18  ;;  %v431_v38 = vld [vmem:[%s1428_s4 + $0x10] sm:$0xff]  ;;  %v36_v39 = vld [vmem:[%s1424_s0 + $0x8] sm:$0xff]  ;;  %v429_v41 = vld [vmem:[%s1428_s4] sm:$0xff] }
  0x1f   :  { %110 = vperm.xlu0 %1024, %v72_v22   ;;  %105 = vperm.xlu1 %1025, %v71_v23   ;;  %v430_v40 = vld [vmem:[%s1428_s4 + $0x8] sm:$0xff]  ;;  %v35_v42 = vld [vmem:[%s1424_s0] sm:$0xff]  ;;  %v596_v45 = vld [vmem:[%s1430_s6 + $0x10] sm:$0xff] }
  0x20   :  { %v594_v43 = vld [vmem:[%s1430_s6] sm:$0xff]  ;;  %v595_v44 = vld [vmem:[%s1430_s6 + $0x8] sm:$0xff]  ;;  %v597_v46 = vld [vmem:[%s1430_s6 + $0x18] sm:$0xff] }
  0x21   :  { %915 = vmatpush3.xpose.msk.msra.mxu0 %vm163_vm0, %v43_v18  ;;  %v52_v47 = vld [vmem:[%s1425_s1 + $0x8] sm:$0xff]  ;;  %v53_v48 = vld [vmem:[%s1425_s1 + $0x10] sm:$0xff]  ;;  %v732_v49 = vld [vmem:[%s1431_s7] sm:$0xff] }
  0x22   :  { %916 = vmatprep.subr.msk.mxu0 %vm163_vm0, %v42_v21  ;;  %v733_v50 = vld [vmem:[%s1431_s7 + $0x8] sm:$0xff]  ;;  %v54_v51 = vld [vmem:[%s1425_s1 + $0x18] sm:$0xff]  ;;  %v55_v52 = vld [vmem:[%s1425_s1 + $0x20] sm:$0xff] }
  0x23   :  { %100 = vperm.xlu0 %1024, %v70_v25   ;;  %95 = vperm.xlu1 %1025, %v69_v26   ;;  %v734_v53 = vld [vmem:[%s1431_s7 + $0x10] sm:$0xff]  ;;  %v735_v54 = vld [vmem:[%s1431_s7 + $0x18] sm:$0xff]  ;;  %v56_v55 = vld [vmem:[%s1425_s1 + $0x28] sm:$0xff] }
  0x24   :  { %v57_v56 = vld [vmem:[%s1425_s1 + $0x30] sm:$0xff]  ;;  %v769_v57 = vld [vmem:[#allocation2] sm:$0x1]  ;;  %v58_v58 = vld [vmem:[%s1425_s1 + $0x38] sm:$0xff] }
  0x25   :  { %917 = vmatpush3.xpose.msk.msra.mxu0 %vm163_vm0, %v42_v21  ;;  %v59_v59 = vld [vmem:[%s1425_s1 + $0x40] sm:$0xff]  ;;  %v60_v60 = vld [vmem:[%s1425_s1 + $0x48] sm:$0xff]  ;;  %v61_v61 = vld [vmem:[%s1425_s1 + $0x50] sm:$0xff] }
  0x26   :  { %918 = vmatprep.subr.msk.mxu0 %vm163_vm0, %v41_v24  ;;  %v62_v62 = vld [vmem:[%s1425_s1 + $0x58] sm:$0xff]  ;;  %v63_v63 = vld [vmem:[%s1425_s1 + $0x60] sm:$0xff]  ;;  %v64_v0 = vld [vmem:[%s1425_s1 + $0x68] sm:$0xff] }
  0x27   :  { %90 = vperm.xlu0 %1024, %v68_v28   ;;  %85 = vperm.xlu1 %1025, %v67_v29   ;;  %v65_v1 = vld [vmem:[%s1425_s1 + $0x70] sm:$0xff]  ;;  %v66_v2 = vld [vmem:[%s1425_s1 + $0x78] sm:$0xff]  ;;  %v421_v3 = vld [vmem:[%s1427_s3] sm:$0xff] }
  0x28   :  { %988 = vmatprep.mubr.f32.mxu1 %v421_v3 }
  0x29   :  { %919 = vmatpush3.xpose.msk.msra.mxu0 %vm163_vm0, %v41_v24 }
  0x2a   :  { %920 = vmatprep.subr.msk.mxu0 %vm163_vm0, %v40_v27 }
  0x2b   :  { %474 = vperm.xlu0 %1024, %v436_v31   ;;  %469 = vperm.xlu1 %1025, %v435_v32  }
  0x2d   :  { %921 = vmatpush3.xpose.msk.msra.mxu0 %vm163_vm0, %v40_v27 }
  0x2e   :  { %922 = vmatprep.subr.msk.mxu0 %vm163_vm0, %v39_v30 }
  0x2f   :  { %464 = vperm.xlu0 %1024, %v434_v34   ;;  %459 = vperm.xlu1 %1025, %v433_v35  }
  0x31   :  { %923 = vmatpush3.xpose.msk.msra.mxu0 %vm163_vm0, %v39_v30 }
  0x32   :  { %924 = vmatprep.subr.msk.mxu0 %vm163_vm0, %v38_v33 }
  0x33   :  { %454 = vperm.xlu0 %1024, %v432_v37   ;;  %449 = vperm.xlu1 %1025, %v431_v38  }
  0x35   :  { %925 = vmatpush3.xpose.msk.msra.mxu0 %vm163_vm0, %v38_v33 }
  0x36   :  { %926 = vmatprep.subr.msk.mxu0 %vm163_vm0, %v37_v36 }
  0x37   :  { %444 = vperm.xlu0 %1024, %v430_v40   ;;  %439 = vperm.xlu1 %1025, %v429_v41  }
  0x39   :  { %927 = vmatpush3.xpose.msk.msra.mxu0 %vm163_vm0, %v37_v36 }
  0x3a   :  { %928 = vmatprep.subr.msk.mxu0 %vm163_vm0, %v36_v39 }
  0x3b   :  { %600 = vperm.xlu0 %1024, %v594_v43   ;;  %605 = vperm.xlu1 %1025, %v595_v44  }
  0x3d   :  { %929 = vmatpush3.xpose.msk.msra.mxu0 %vm163_vm0, %v36_v39 }
  0x3e   :  { %930 = vmatprep.subr.msk.mxu0 %vm163_vm0, %v35_v42 }
  0x3f   :  { %610 = vperm.xlu0 %1024, %v596_v45   ;;  %615 = vperm.xlu1 %1025, %v597_v46  }
  0x41   :  { %931 = vmatpush3.xpose.msk.msra.mxu0 %vm163_vm0, %v35_v42 }
  0x43   :  { %738 = vperm.xlu0 %1024, %v732_v49   ;;  %743 = vperm.xlu1 %1025, %v733_v50  }
  0x44   :  { %933 = vmatmul.mubr.msk.f32.vlgmr.msra.gmra.mxu0 %vm163_vm0, %v52_v47 }
  0x45   :  { %935 = vmatprep.mubr.msk.f32.mxu0 %vm163_vm0, %v53_v48 }
  0x47   :  { %748 = vperm.xlu0 %1024, %v734_v53   ;;  %753 = vperm.xlu1 %1025, %v735_v54  }
  0x48   :  { %936 = vmatmul.mubr.msk.f32.gmra.mxu0 %vm163_vm0, %v54_v51 }
  0x49   :  { %938 = vmatprep.mubr.msk.f32.mxu0 %vm163_vm0, %v55_v52 }
  0x4b   :  { %772 = vperm.xlu0 %1024, %v769_v57  }
  0x4c   :  { %939 = vmatmul.mubr.msk.f32.gmra.mxu0 %vm163_vm0, %v56_v55 }
  0x4d   :  { %941 = vmatprep.mubr.msk.f32.mxu0 %vm163_vm0, %v57_v56 }
  0x50   :  { %942 = vmatmul.mubr.msk.f32.gmra.mxu0 %vm163_vm0, %v58_v58 }
  0x51   :  { %944 = vmatprep.mubr.msk.f32.mxu0 %vm163_vm0, %v59_v59 }
  0x54   :  { %945 = vmatmul.mubr.msk.f32.gmra.mxu0 %vm163_vm0, %v60_v60 }
  0x55   :  { %947 = vmatprep.mubr.msk.f32.mxu0 %vm163_vm0, %v61_v61 }
  0x58   :  { %948 = vmatmul.mubr.msk.f32.gmra.mxu0 %vm163_vm0, %v62_v62 }
  0x59   :  { %950 = vmatprep.mubr.msk.f32.mxu0 %vm163_vm0, %v63_v63 }
  0x5c   :  { %951 = vmatmul.mubr.msk.f32.gmra.mxu0 %vm163_vm0, %v64_v0 }
  0x5d   :  { %953 = vmatprep.mubr.msk.f32.mxu0 %vm163_vm0, %v65_v1 }
  0x60   :  { %954 = vmatmul.mubr.msk.f32.gmra.mxu0 %vm163_vm0, %v66_v2 }
  0x82   :  { %v161_v10 = vpop.permute.xlu0 %160  ;;  %v151_v12 = vpop.permute.xlu1 %150 }
  0x86   :  { %v156_v15 = vpop.permute.xlu0 %155  ;;  %v146_v17 = vpop.permute.xlu1 %145 }
  0x8a   :  { %v141_v20 = vpop.permute.xlu0 %140  ;;  %v136_v22 = vpop.permute.xlu1 %135 }
  0x92   :  { %v131_v26 = vpop.permute.xlu0 %130  ;;  %v126_v31 = vpop.permute.xlu1 %125 }
  0x96   :  { %v121_v36 = vpop.permute.xlu0 %120  ;;  %v116_v39 = vpop.permute.xlu1 %115 }
  0x9a   :  { %v111_v44 = vpop.permute.xlu0 %110  ;;  %v106_v47 = vpop.permute.xlu1 %105 }
  0x9e   :  { %v101_v52 = vpop.permute.xlu0 %100  ;;  %v96_v55 = vpop.permute.xlu1 %95 }
  0xa2   :  { %v91_v60 = vpop.permute.xlu0 %90  ;;  %v86_v63 = vpop.permute.xlu1 %85 }
 0x104   :  { %v1372_v4 = vpop.f32.mrf.mxu0 }
 0x105   :  { %v332_v61 = vadd.f32 %v1372_v4, %v91_v60  ;;  %v423_v4 = vld [vmem:[%s1427_s3 + $0x10] sm:$0xff] }
 0x106   :  { %v1374_v5 = vpop.f32.mrf.mxu0 }
 0x107   :  { %v327_v0 = vadd.f32 %v1374_v5, %v86_v63  ;;  %v406_v2 = vmax.f32 %v332_v61, 0.0  ;;  %v424_v5 = vld [vmem:[%s1427_s3 + $0x18] sm:$0xff] }
 0x108   :  { %v1376_v6 = vpop.f32.mrf.mxu0 }
 0x109   :  { %v342_v56 = vadd.f32 %v1376_v6, %v101_v52  ;;  %v405_v3 = vmax.f32 %v327_v0, 0.0  ;;  %v422_v6 = vld [vmem:[%s1427_s3 + $0x8] sm:$0xff] }
 0x10a   :  { %v1378_v7 = vpop.f32.mrf.mxu0 }
 0x10b   :  { %v337_v58 = vadd.f32 %v1378_v7, %v96_v55  ;;  %v408_v62 = vmax.f32 %v342_v56, 0.0  ;;  %v425_v7 = vld [vmem:[%s1427_s3 + $0x20] sm:$0xff] }
 0x10c   :  { %v940_v8 = vpop.f32.mrf.mxu0 }
 0x10d   :  { %v352_v50 = vadd.f32 %v940_v8, %v111_v44  ;;  %v407_v1 = vmax.f32 %v337_v58, 0.0  ;;  %v426_v8 = vld [vmem:[%s1427_s3 + $0x28] sm:$0xff] }
 0x10e   :  { %v346_v9 = vpop.f32.mrf.mxu0  ;;  %v591_v44 = vld [vmem:[%s1429_s5 + $0x8] sm:$0xff] }
 0x10f   :  { %v347_v53 = vadd.f32 %v346_v9, %v106_v47  ;;  %v410_v57 = vmax.f32 %v352_v50, 0.0  ;;  %v427_v9 = vld [vmem:[%s1427_s3 + $0x30] sm:$0xff] }
 0x110   :  { %v943_v11 = vpop.f32.mrf.mxu0 }
 0x111   :  { %v362_v45 = vadd.f32 %v943_v11, %v121_v36  ;;  %v409_v59 = vmax.f32 %v347_v53, 0.0  ;;  %v590_v11 = vld [vmem:[%s1429_s5] sm:$0xff] }
 0x112   :  { %v356_v13 = vpop.f32.mrf.mxu0 }
 0x113   :  { %v357_v48 = vadd.f32 %v356_v13, %v116_v39  ;;  %v412_v51 = vmax.f32 %v362_v45, 0.0  ;;  %v592_v45 = vld [vmem:[%s1429_s5 + $0x10] sm:$0xff] }
 0x114   :  { %v946_v14 = vpop.f32.mrf.mxu0 }
 0x115   :  { %v372_v40 = vadd.f32 %v946_v14, %v131_v26  ;;  %v411_v54 = vmax.f32 %v357_v48, 0.0  ;;  %v475_v14 = vpop.permute.xlu0 %474 }
 0x116   :  { %v366_v16 = vpop.f32.mrf.mxu0 }
 0x117   :  { %v367_v42 = vadd.f32 %v366_v16, %v126_v31  ;;  %v414_v46 = vmax.f32 %v372_v40, 0.0  ;;  %v470_v16 = vpop.permute.xlu1 %469 }
 0x118   :  { %v949_v18 = vpop.f32.mrf.mxu0 }
 0x119   :  { %v382_v34 = vadd.f32 %v949_v18, %v141_v20  ;;  %v413_v49 = vmax.f32 %v367_v42, 0.0 }
 0x11a   :  { %v376_v19 = vpop.f32.mrf.mxu0 }
 0x11b   :  { %v377_v37 = vadd.f32 %v376_v19, %v136_v22  ;;  %v416_v41 = vmax.f32 %v382_v34, 0.0  ;;  %v465_v19 = vpop.permute.xlu0 %464 }
 0x11c   :  { %v952_v21 = vpop.f32.mrf.mxu0 }
 0x11d   :  { %v392_v28 = vadd.f32 %v952_v21, %v151_v12  ;;  %v415_v43 = vmax.f32 %v377_v37, 0.0  ;;  %v460_v21 = vpop.permute.xlu1 %459 }
 0x11e   :  { %v386_v23 = vpop.f32.mrf.mxu0 }
 0x11f   :  { %v387_v32 = vadd.f32 %v386_v23, %v146_v17  ;;  %v418_v35 = vmax.f32 %v392_v28, 0.0 }
 0x120   :  { %v955_v24 = vpop.f32.mrf.mxu0 }
 0x121   :  { %v402_v25 = vadd.f32 %v955_v24, %v161_v10  ;;  %v417_v38 = vmax.f32 %v387_v32, 0.0  ;;  %v428_v10 = vld [vmem:[%s1427_s3 + $0x38] sm:$0xff] }
 0x122   :  { %v396_v27 = vpop.f32.mrf.mxu0 }
 0x123   :  { %v420_v29 = vmax.f32 %v402_v25, 0.0  ;;  %v397_v30 = vadd.f32 %v396_v27, %v156_v15  ;;  %v455_v27 = vpop.permute.xlu0 %454 }
 0x125   :  { %v419_v33 = vmax.f32 %v397_v30, 0.0  ;;  %956 = vmatprep.subr.mxu1 %v420_v29 }
 0x126   :  { %957 = vmatpush3.msra.mxu1 %v420_v29  ;;  %v450_v29 = vpop.permute.xlu1 %449 }
 0x127   :  { %958 = vmatprep.subr.mxu1 %v419_v33  ;;  %v445_v32 = vpop.permute.xlu0 %444 }
 0x128   :  { %959 = vmatpush3.msra.mxu1 %v419_v33 }
 0x129   :  { %960 = vmatprep.subr.mxu1 %v418_v35 }
 0x12a   :  { %961 = vmatpush3.msra.mxu1 %v418_v35  ;;  %v440_v34 = vpop.permute.xlu1 %439 }
 0x12b   :  { %962 = vmatprep.subr.mxu1 %v417_v38  ;;  %v601_v48 = vpop.permute.xlu0 %600 }
 0x12c   :  { %963 = vmatpush3.msra.mxu1 %v417_v38 }
 0x12d   :  { %964 = vmatprep.subr.mxu1 %v416_v41 }
 0x12e   :  { %965 = vmatpush3.msra.mxu1 %v416_v41  ;;  %v606_v47 = vpop.permute.xlu1 %605 }
 0x12f   :  { %966 = vmatprep.subr.mxu1 %v415_v43  ;;  %v611_v58 = vpop.permute.xlu0 %610 }
 0x130   :  { %967 = vmatpush3.msra.mxu1 %v415_v43 }
 0x131   :  { %968 = vmatprep.subr.mxu1 %v414_v46 }
 0x132   :  { %969 = vmatpush3.msra.mxu1 %v414_v46  ;;  %v593_v46 = vld [vmem:[%s1429_s5 + $0x18] sm:$0xff]  ;;  %s1075_s5 = smov [#allocation3]  }
 0x133   :  { %970 = vmatprep.subr.mxu1 %v413_v49  ;;  %s788_s8 = sshll.u32 %s1075_s5, 4  ;;  %s789_s8 = int_to_ptr.vmem [resolvable:$true] %s788_s8 }
 0x134   :  { %971 = vmatpush3.msra.mxu1 %v413_v49  ;;  %s1052_s6 = scalar_lea.vmem %s789_s8, 16  ;;  %s1056_s15 = scalar_lea.vmem %s789_s8, 32 }
 0x135   :  { %972 = vmatprep.subr.mxu1 %v412_v51  ;;  %p1053_p0 = scmp.ne.s32.totalorder %s789_s8, %s1052_s6  ;;  %p1057_p1 = scmp.lt.s32.totalorder %s789_s8, %s789_s8 }
 0x136   :  { %973 = vmatpush3.msra.mxu1 %v412_v51  ;;  %p1058_p2 = scmp.lt.s32.totalorder %s1056_s15, %s1052_s6 }
 0x137   :  { %974 = vmatprep.subr.mxu1 %v411_v54 }
 0x138   :  { %975 = vmatpush3.msra.mxu1 %v411_v54  ;;  %v616_v54 = vpop.permute.xlu1 %615  ;;  %p1059_p3 = por %p1058_p2, %p1057_p1 }
 0x139   :  { %976 = vmatprep.subr.mxu1 %v410_v57 }
 0x13a   :  { %977 = vmatpush3.msra.mxu1 %v410_v57  ;;  %p1060_p4 = pnand %p1059_p3, %p1053_p0 }
 0x13b   :  { %978 = vmatprep.subr.mxu1 %v409_v59 }
 0x13c   :  { %979 = vmatpush3.msra.mxu1 %v409_v59 }
 0x13d   :  { %980 = vmatprep.subr.mxu1 %v408_v62 }
 0x13e   :  { %981 = vmatpush3.msra.mxu1 %v408_v62 }
 0x13f   :  { %982 = vmatprep.subr.mxu1 %v407_v1 }
 0x140   :  { %983 = vmatpush3.msra.mxu1 %v407_v1 }
 0x141   :  { %984 = vmatprep.subr.mxu1 %v406_v2 }
 0x142   :  { %985 = vmatpush3.msra.mxu1 %v406_v2 }
 0x143   :  { %986 = vmatprep.subr.mxu1 %v405_v3 }
 0x144   :  { %987 = vmatpush3.msra.mxu1 %v405_v3 }
 0x145   :  { %989 = vmatmul.mubr.f32.vlgmr.msra.gmra.mxu1 %v422_v6  ;;  %v739_v6 = vpop.permute.xlu0 %738 }
 0x146   :  { %991 = vmatprep.mubr.f32.mxu1 %v423_v4 }
 0x149   :  { %992 = vmatmul.mubr.f32.gmra.mxu1 %v424_v5 }
 0x14a   :  { %994 = vmatprep.mubr.f32.mxu1 %v425_v7 }
 0x14d   :  { %995 = vmatmul.mubr.f32.gmra.mxu1 %v426_v8 }
 0x14e   :  { %997 = vmatprep.mubr.f32.mxu1 %v427_v9  ;;  %v744_v9 = vpop.permute.xlu1 %743 }
 0x151   :  { %998 = vmatmul.mubr.f32.gmra.mxu1 %v428_v10 }
 0x152   :  { %1016 = vmatprep.mubr.msk.f32.mxu1 %vm618_vm1, %v590_v11 }
 0x205   :  { %v990_v12 = vpop.f32.mrf.mxu1 }
 0x206   :  { %v549_v33 = vadd.f32 %v990_v12, %v445_v32 }
 0x207   :  { %v543_v13 = vpop.f32.mrf.mxu1 }
 0x208   :  { %v544_v35 = vadd.f32 %v543_v13, %v440_v34 }
 0x209   :  { %v993_v15 = vpop.f32.mrf.mxu1 }
 0x20a   :  { %v559_v30 = vadd.f32 %v993_v15, %v455_v27  ;;  %v749_v15 = vpop.permute.xlu0 %748 }
 0x20b   :  { %v553_v17 = vpop.f32.mrf.mxu1 }
 0x20c   :  { %v554_v31 = vadd.f32 %v553_v17, %v450_v29 }
 0x20d   :  { %v996_v18 = vpop.f32.mrf.mxu1 }
 0x20e   :  { %v569_v25 = vadd.f32 %v996_v18, %v465_v19  ;;  %v754_v18 = vpop.permute.xlu1 %753  ;;  %v773_v29 = vpop.permute.xlu0 %772 }
 0x20f   :  { %v563_v20 = vpop.f32.mrf.mxu1 }
 0x210   :  { %v564_v28 = vadd.f32 %v563_v20, %v460_v21  ;;  %v775_v21 = vlaneseq }
 0x211   :  { %v999_v22 = vpop.f32.mrf.mxu1 }
 0x212   :  { %v579_v23 = vadd.f32 %v999_v22, %v475_v14 }
 0x213   :  { %v573_v24 = vpop.f32.mrf.mxu1 }
 0x214   :  { %1026 = vtanh.f32 %v579_v23  ;;  %v574_v26 = vadd.f32 %v573_v24, %v470_v16  ;;  %v776_v24 = vshrl.u32 %v775_v21, 7 }
 0x216   :  { %1028 = vtanh.f32 %v574_v26  ;;  %v777_v27 = vsub.s32 0, %v776_v24 }
 0x217   :  { %1030 = vtanh.f32 %v569_v25 }
 0x218   :  { %1032 = vtanh.f32 %v564_v28 }
 0x219   :  { %1034 = vtanh.f32 %v559_v30 }
 0x21a   :  { %1036 = vtanh.f32 %v554_v31  ;;  %v778_v31 = vrot.slane %v773_v29, %v777_v27 }
 0x21b   :  { %1038 = vtanh.f32 %v549_v33 }
 0x21c   :  { %1040 = vtanh.f32 %v544_v35 }
 0x221   :  { %v1027_v36 = vpop.eup %1026 }
 0x222   :  { %1000 = vmatprep.subr.mxu1 %v1027_v36 }
 0x223   :  { %v1029_v37 = vpop.eup %1028  ;;  %1001 = vmatpush3.msra.mxu1 %v1027_v36 }
 0x224   :  { %1002 = vmatprep.subr.mxu1 %v1029_v37  ;;  %v1031_v38 = vpop.eup %1030 }
 0x225   :  { %1003 = vmatpush3.msra.mxu1 %v1029_v37  ;;  %v1033_v39 = vpop.eup %1032 }
 0x226   :  { %1004 = vmatprep.subr.mxu1 %v1031_v38  ;;  %v1035_v40 = vpop.eup %1034 }
 0x227   :  { %1005 = vmatpush3.msra.mxu1 %v1031_v38  ;;  %v1037_v41 = vpop.eup %1036 }
 0x228   :  { %1006 = vmatprep.subr.mxu1 %v1033_v39  ;;  %v1039_v42 = vpop.eup %1038 }
 0x229   :  { %1007 = vmatpush3.msra.mxu1 %v1033_v39  ;;  %v1041_v43 = vpop.eup %1040 }
 0x22a   :  { %1008 = vmatprep.subr.mxu1 %v1035_v40 }
 0x22b   :  { %1009 = vmatpush3.msra.mxu1 %v1035_v40 }
 0x22c   :  { %1010 = vmatprep.subr.mxu1 %v1037_v41 }
 0x22d   :  { %1011 = vmatpush3.msra.mxu1 %v1037_v41 }
 0x22e   :  { %1012 = vmatprep.subr.mxu1 %v1039_v42 }
 0x22f   :  { %1013 = vmatpush3.msra.mxu1 %v1039_v42 }
 0x230   :  { %1014 = vmatprep.subr.mxu1 %v1041_v43 }
 0x231   :  { %1015 = vmatpush3.msra.mxu1 %v1041_v43 }
 0x232   :  { %1017 = vmatmul.mubr.msk.f32.vlgmr.msra.gmra.mxu1 %vm618_vm1, %v591_v44 }
 0x233   :  { %1019 = vmatprep.mubr.msk.f32.mxu1 %vm618_vm1, %v592_v45 }
 0x236   :  { %1020 = vmatmul.mubr.msk.f32.gmra.mxu1 %vm618_vm1, %v593_v46 }
 0x2f2   :  { %v1018_v49 = vpop.f32.mrf.mxu1 }
 0x2f3   :  { %v703_v50 = vadd.f32 %v1018_v49, %v606_v47 }
 0x2f4   :  { %v697_v51 = vpop.f32.mrf.mxu1 }
 0x2f5   :  { %v717_v52 = vmul.f32 0.5, %v703_v50  ;;  %v698_v53 = vadd.f32 %v697_v51, %v601_v48 }
 0x2f6   :  { %v1021_v55 = vpop.f32.mrf.mxu1 }
 0x2f7   :  { %1042 = vtanh.f32 %v717_v52  ;;  %v716_v56 = vmul.f32 0.5, %v698_v53  ;;  %v713_v57 = vadd.f32 %v1021_v55, %v616_v54 }
 0x2f8   :  { %v707_v59 = vpop.f32.mrf.mxu1 }
 0x2f9   :  { %1044 = vtanh.f32 %v716_v56  ;;  %v719_v60 = vmul.f32 0.5, %v713_v57  ;;  %v708_v61 = vadd.f32 %v707_v59, %v611_v58 }
 0x2fb   :  { %1046 = vtanh.f32 %v719_v60  ;;  %v718_v62 = vmul.f32 0.5, %v708_v61 }
 0x2fd   :  { %1048 = vtanh.f32 %v718_v62 }
 0x304   :  { %v1043_v63 = vpop.eup %1042 }
 0x305   :  { %v725_v0 = vadd.f32 1.0, %v1043_v63 }
 0x306   :  { %v1045_v1 = vpop.eup %1044 }
 0x307   :  { %v724_v2 = vadd.f32 1.0, %v1045_v1  ;;  %v729_v4 = vmul.f32 0.5, %v725_v0 }
 0x308   :  { %v1047_v3 = vpop.eup %1046 }
 0x309   :  { %v728_v5 = vmul.f32 0.5, %v724_v2  ;;  %v727_v7 = vadd.f32 1.0, %v1047_v3  ;;  %v757_v12 = vmul.f32 %v744_v9, %v729_v4 }
 0x30a   :  { %v1049_v8 = vpop.eup %1048 }
 0x30b   :  { %v756_v10 = vmul.f32 %v739_v6, %v728_v5  ;;  %v726_v11 = vadd.f32 1.0, %v1049_v8  ;;  %v731_v13 = vmul.f32 0.5, %v727_v7 }
 0x30d   :  { %v730_v14 = vmul.f32 0.5, %v726_v11  ;;  %v760_v16 = vadd.f32 %v757_v12, %v756_v10  ;;  %v759_v19 = vmul.f32 %v754_v18, %v731_v13 }
 0x30f   :  { %v758_v17 = vmul.f32 %v749_v15, %v730_v14 }
 0x311   :  { %v761_v20 = vadd.f32 %v760_v16, %v758_v17 }
 0x313   :  { %v762_v22 = vadd.f32 %v761_v20, %v759_v19 }
 0x315   :  { %v763_v23 = vrot.slane %v762_v22, 4 }
 0x317   :  { %v764_v25 = vadd.f32 %v763_v23, %v762_v22 }
 0x319   :  { %v765_v26 = vrot.slane %v764_v25, 2 }
 0x31b   :  { %v766_v28 = vadd.f32 %v765_v26, %v764_v25 }
 0x31d   :  { %v767_v30 = vrot.slane %v766_v28, 1 }
 0x31f   :  { %v768_v32 = vadd.f32 %v767_v30, %v766_v28 }
 0x321   :  { %v779_v33 = vadd.f32 %v778_v31, %v768_v32 }
 0x323   :  { %1050 = vtanh.f32 %v779_v33 }
 0x330   :  { %v1051_v34 = vpop.eup %1050 }
 0x331   :  { %781 = vst [vmem:[#allocation3] sm:$0x1] %v1051_v34 }
 0x332   :  { %1063 = shalt.err (!%p1060_p4)
}
 0x333   :  { %791 = dma.vmem_to_hbm [thread:$0]  %s789_s8, 16, %s1433_s9, [#allocation4]  }
 0x334   :  { %1072 = dma.done.wait [#allocation4], 16  }
 0x335   :  { %1073 = vsyncadd [#allocation4], 4294967280 }
 0x336   :  { %795 = vsyncpa [#allocation4], 1 }

</bundles_post_ra>
